<compile_context>
chip_gen: v5e
topology: v5e:2x2
jax: 0.10.0
libtpu: 0.0.40
codegen_flags: <defaults>
</compile_context>

<pallas_src>
import functools

import jax
import jax.numpy as jnp
from jax import lax
from jax.experimental import pallas as pl
from jax.experimental.pallas import tpu as pltpu


def _full_spec(shape):
    # whole-array block (grid=(1,)); block dims == full array dims
    return pl.BlockSpec(shape, lambda i, _nd=len(shape): (0,) * _nd)


# ---------------------------------------------------------------------------
# Single fused kernel: conv1 -> relu -> conv2 -> relu -> mean-pool -> MLP head.
# Per-layer math (PyG TransformerConv, heads=1):
#   [q|k|v|skip] = x @ W_qkvs + b_qkvs                (one fused matmul)
#   alpha_ij = softmax_j( q_i . k_j / sqrt(C) )       over incoming edges j->i
#   out_i    = sum_j alpha_ij v_j + skip_i            ; relu
# Nodes with no incoming edges get only the skip term (alpha row = 0),
# matching PyG's sparse softmax behaviour.
# ---------------------------------------------------------------------------
def _fused_forward_kernel(x_ref, adj_ref,
                          w1_ref, b1_ref, w2_ref, b2_ref,
                          wl1_ref, bl1_ref, wl2_ref, bl2_ref, wl3_ref, bl3_ref,
                          o_ref, *, c, scale, inv_n, n_classes):
    x = x_ref[...]                       # bf16 [N, F]
    edge_mask = adj_ref[...] > 0         # bool [N, N], adj[dst, src]

    def conv_relu(h_bf16, w_ref, b_ref):
        # Fused q|k|v|skip projection: one wide MXU matmul, f32 accumulate.
        p = jnp.dot(h_bf16, w_ref[...],
                    preferred_element_type=jnp.float32) + b_ref[...]
        q = p[:, 0 * c:1 * c]
        k = p[:, 1 * c:2 * c]
        v = p[:, 2 * c:3 * c]
        skip = p[:, 3 * c:4 * c]

        # scores[i, j] = q_i . k_j / sqrt(C): contract last dims, no transpose.
        s = lax.dot_general(q.astype(jnp.bfloat16), k.astype(jnp.bfloat16),
                            dimension_numbers=(((1,), (1,)), ((), ())),
                            preferred_element_type=jnp.float32) * scale

        # Masked softmax over incoming edges (f32 math).
        s_masked = jnp.where(edge_mask, s, -1e30)
        m = jnp.max(s_masked, axis=-1, keepdims=True)
        e = jnp.where(edge_mask, jnp.exp(s - m), 0.0)
        denom = jnp.sum(e, axis=-1, keepdims=True)
        alpha = e * pl.reciprocal(jnp.where(denom > 0.0, denom, 1.0),
                                  approx=True)

        agg = jnp.dot(alpha.astype(jnp.bfloat16), v.astype(jnp.bfloat16),
                      preferred_element_type=jnp.float32)
        return jnp.maximum(agg + skip, 0.0)          # fused ReLU, f32 [N, C]

    h = conv_relu(x, w1_ref, b1_ref)
    # dropout: identity (eval)
    h = conv_relu(h.astype(jnp.bfloat16), w2_ref, b2_ref)
    # dropout: identity (eval)

    # global_mean_pool(batch=None): (1/N) * (ones @ h) on the MXU.
    h_bf = h.astype(jnp.bfloat16)
    ones_row = jnp.ones((1, h_bf.shape[0]), jnp.bfloat16)
    pooled = jnp.dot(ones_row, h_bf, preferred_element_type=jnp.float32) * inv_n

    def elu(z):
        return jnp.where(z > 0.0, z, jnp.exp(z) - 1.0)

    z = elu(jnp.dot(pooled.astype(jnp.bfloat16), wl1_ref[...],
                    preferred_element_type=jnp.float32) + bl1_ref[...])
    z = elu(jnp.dot(z.astype(jnp.bfloat16), wl2_ref[...],
                    preferred_element_type=jnp.float32) + bl2_ref[...])
    z = elu(jnp.dot(z.astype(jnp.bfloat16), wl3_ref[...],
                    preferred_element_type=jnp.float32) + bl3_ref[...])

    if n_classes == 1:
        o_ref[...] = z
    elif n_classes == 10:
        m = jnp.max(z, axis=1, keepdims=True)
        lse = jnp.log(jnp.sum(jnp.exp(z - m), axis=1, keepdims=True)) + m
        o_ref[...] = z - lse                                  # log_softmax
    else:
        m = jnp.max(z, axis=1, keepdims=True)
        ez = jnp.exp(z - m)
        o_ref[...] = ez / jnp.sum(ez, axis=1, keepdims=True)  # softmax


# ---------------------------------------------------------------------------
# Glue: parameter init, dense adjacency, end-to-end forward.
# ---------------------------------------------------------------------------
def init_linear(key, fan_in, fan_out):
    kw, kb = jax.random.split(key)
    w = jax.random.normal(kw, (fan_in, fan_out), jnp.float32) / jnp.sqrt(
        jnp.float32(fan_in))
    b = 0.01 * jax.random.normal(kb, (1, fan_out), jnp.float32)
    return w, b


def init_transformer_conv(key, in_ch, out_ch):
    ks = jax.random.split(key, 4)
    wq, bq = init_linear(ks[0], in_ch, out_ch)
    wk, bk = init_linear(ks[1], in_ch, out_ch)
    wv, bv = init_linear(ks[2], in_ch, out_ch)
    ws, bs = init_linear(ks[3], in_ch, out_ch)
    return dict(wq=wq, bq=bq, wk=wk, bk=bk, wv=wv, bv=bv, ws=ws, bs=bs)


def edges_to_dense_adj(edge_index, num_nodes):
    # adj[dst, src] = 1 iff edge src->dst exists. Built as bf16 to halve traffic.
    # TODO(synk): for large graphs, build the per-tile mask in-kernel from a
    #             scalar-prefetched edge list instead of a dense N x N array.
    src, dst = edge_index[0], edge_index[1]
    adj = jnp.zeros((num_nodes, num_nodes), jnp.bfloat16)
    return adj.at[dst, src].set(1.0)


def _fuse_qkvs(p):
    w = jnp.concatenate([p["wq"], p["wk"], p["wv"], p["ws"]],
                        axis=1).astype(jnp.bfloat16)      # [F, 4C]
    b = jnp.concatenate([p["bq"], p["bk"], p["bv"], p["bs"]],
                        axis=1).astype(jnp.float32)       # [1, 4C]
    return w, b


def transformer_conv2_forward(x, edge_index, params, n_classes):
    n = x.shape[0]
    c = params["conv1"]["wq"].shape[1]
    adj = edges_to_dense_adj(edge_index, n)

    w1, b1 = _fuse_qkvs(params["conv1"])
    w2, b2 = _fuse_qkvs(params["conv2"])
    head = params["head"]

    args = (x.astype(jnp.bfloat16), adj, w1, b1, w2, b2,
            head["w1"].astype(jnp.bfloat16), head["b1"].astype(jnp.float32),
            head["w2"].astype(jnp.bfloat16), head["b2"].astype(jnp.float32),
            head["w3"].astype(jnp.bfloat16), head["b3"].astype(jnp.float32))

    kernel = functools.partial(_fused_forward_kernel, c=c,
                               scale=1.0 / float(c) ** 0.5,
                               inv_n=1.0 / float(n), n_classes=n_classes)

    # TODO(synk): for large N, switch to a flash-attention-style tiled grid
    #             (dst tiles parallel, src/reduction axis last) so the N x N
    #             scores never exceed VMEM (mandatory on v7x, 64 MiB).
    # TODO(synk): batch_mapping (segmented mean pool) and is_node_classification
    #             branches are not exercised here; batch=None graph path only.
    return pl.pallas_call(
        kernel,
        out_shape=jax.ShapeDtypeStruct((1, n_classes), jnp.float32),
        grid=(1,),
        in_specs=[_full_spec(a.shape) for a in args],
        out_specs=_full_spec((1, n_classes)),
        compiler_params=pltpu.CompilerParams(
            dimension_semantics=("arbitrary",)),
    )(*args)


if __name__ == "__main__":
    key = jax.random.PRNGKey(0)

    # small shapes consistent with the module
    N_NODES = 16
    N_FEATURES = 4
    H_DIM = 32
    C = H_DIM // 2          # 16
    N_CLASSES = 3           # -> softmax branch

    k_x, k_c1, k_c2, k_l1, k_l2, k_l3 = jax.random.split(key, 6)

    x = jax.random.normal(k_x, (N_NODES, N_FEATURES), jnp.float32)

    # deterministic ring graph (both directions): 2 * N edges
    src = jnp.concatenate([jnp.arange(N_NODES), (jnp.arange(N_NODES) + 1) % N_NODES])
    dst = jnp.concatenate([(jnp.arange(N_NODES) + 1) % N_NODES, jnp.arange(N_NODES)])
    edge_index = jnp.stack([src, dst]).astype(jnp.int32)   # [2, 32]

    w1, b1 = init_linear(k_l1, C, 64)
    w2, b2 = init_linear(k_l2, 64, 128)
    w3, b3 = init_linear(k_l3, 128, N_CLASSES)

    params = dict(
        conv1=init_transformer_conv(k_c1, N_FEATURES, C),
        conv2=init_transformer_conv(k_c2, C, C),
        head=dict(w1=w1, b1=b1, w2=w2, b2=b2, w3=w3, b3=b3),
    )

    out = transformer_conv2_forward(x, edge_index, params, N_CLASSES)
    out = jax.block_until_ready(out)
    assert out.shape == (1, N_CLASSES)
    assert bool(jnp.all(jnp.isfinite(out)))
    # softmax rows sum to ~1
    assert bool(jnp.abs(jnp.sum(out) - 1.0) < 1e-3)
    print("KERNEL_OK")
</pallas_src>

<mosaic_0001>
module attributes {stable_mosaic.version = 11 : i64} {
  func.func @_fused_forward_kernel(%arg0: i32, %arg1: memref<16x4xbf16, #tpu.memory_space<vmem>>, %arg2: memref<16x16xbf16, #tpu.memory_space<vmem>>, %arg3: memref<4x64xbf16, #tpu.memory_space<vmem>>, %arg4: memref<1x64xf32, #tpu.memory_space<vmem>>, %arg5: memref<16x64xbf16, #tpu.memory_space<vmem>>, %arg6: memref<1x64xf32, #tpu.memory_space<vmem>>, %arg7: memref<16x64xbf16, #tpu.memory_space<vmem>>, %arg8: memref<1x64xf32, #tpu.memory_space<vmem>>, %arg9: memref<64x128xbf16, #tpu.memory_space<vmem>>, %arg10: memref<1x128xf32, #tpu.memory_space<vmem>>, %arg11: memref<128x3xbf16, #tpu.memory_space<vmem>>, %arg12: memref<1x3xf32, #tpu.memory_space<vmem>>, %arg13: memref<1x3xf32, #tpu.memory_space<vmem>>) attributes {dimension_semantics = [#tpu.dimension_semantics<arbitrary>], iteration_bounds = array<i64: 1>, scalar_prefetch = 0 : i64, scratch_operands = 0 : i64, tpu.core_type = #tpu.core_type<tc>, window_params = [{pipeline_mode = #tpu.pipeline_mode<synchronous>, transform_indices = @transform_0, window_bounds = array<i64: 16, 4>}, {pipeline_mode = #tpu.pipeline_mode<synchronous>, transform_indices = @transform_1, window_bounds = array<i64: 16, 16>}, {pipeline_mode = #tpu.pipeline_mode<synchronous>, transform_indices = @transform_2, window_bounds = array<i64: 4, 64>}, {pipeline_mode = #tpu.pipeline_mode<synchronous>, transform_indices = @transform_3, window_bounds = array<i64: 1, 64>}, {pipeline_mode = #tpu.pipeline_mode<synchronous>, transform_indices = @transform_4, window_bounds = array<i64: 16, 64>}, {pipeline_mode = #tpu.pipeline_mode<synchronous>, transform_indices = @transform_5, window_bounds = array<i64: 1, 64>}, {pipeline_mode = #tpu.pipeline_mode<synchronous>, transform_indices = @transform_6, window_bounds = array<i64: 16, 64>}, {pipeline_mode = #tpu.pipeline_mode<synchronous>, transform_indices = @transform_7, window_bounds = array<i64: 1, 64>}, {pipeline_mode = #tpu.pipeline_mode<synchronous>, transform_indices = @transform_8, window_bounds = array<i64: 64, 128>}, {pipeline_mode = #tpu.pipeline_mode<synchronous>, transform_indices = @transform_9, window_bounds = array<i64: 1, 128>}, {pipeline_mode = #tpu.pipeline_mode<synchronous>, transform_indices = @transform_10, window_bounds = array<i64: 128, 3>}, {pipeline_mode = #tpu.pipeline_mode<synchronous>, transform_indices = @transform_11, window_bounds = array<i64: 1, 3>}, {pipeline_mode = #tpu.pipeline_mode<synchronous>, transform_indices = @transform_12, window_bounds = array<i64: 1, 3>}]} {
    %c0 = arith.constant 0 : index
    %c0_0 = arith.constant 0 : index
    %0 = vector.load %arg1[%c0, %c0_0] : memref<16x4xbf16, #tpu.memory_space<vmem>>, vector<16x4xbf16>
    %c0_1 = arith.constant 0 : index
    %c0_2 = arith.constant 0 : index
    %1 = vector.load %arg2[%c0_1, %c0_2] : memref<16x16xbf16, #tpu.memory_space<vmem>>, vector<16x16xbf16>
    %cst = arith.constant 0.000000e+00 : bf16
    %2 = vector.broadcast %cst : bf16 to vector<16x16xbf16>
    %3 = arith.cmpf ogt, %1, %2 : vector<16x16xbf16>
    %c0_3 = arith.constant 0 : index
    %c0_4 = arith.constant 0 : index
    %4 = vector.load %arg3[%c0_3, %c0_4] : memref<4x64xbf16, #tpu.memory_space<vmem>>, vector<4x64xbf16>
    %cst_5 = arith.constant dense<0.000000e+00> : vector<16x64xf32>
    %5 = tpu.matmul %0, %4, %cst_5 {dimension_numbers = #tpu.dot_dimension_numbers<[1], [0], [0], [1], [0, 0, 1, 1], [], []>} : vector<16x4xbf16>, vector<4x64xbf16>, vector<16x64xf32> -> vector<16x64xf32>
    %c0_6 = arith.constant 0 : index
    %c0_7 = arith.constant 0 : index
    %6 = vector.load %arg4[%c0_6, %c0_7] : memref<1x64xf32, #tpu.memory_space<vmem>>, vector<1x64xf32>
    %7 = vector.broadcast %6 : vector<1x64xf32> to vector<16x64xf32>
    %8 = arith.addf %5, %7 : vector<16x64xf32>
    %9 = vector.extract_strided_slice %8 {offsets = [0, 0], sizes = [16, 16], strides = [1, 1]} : vector<16x64xf32> to vector<16x16xf32>
    %10 = vector.extract_strided_slice %8 {offsets = [0, 16], sizes = [16, 16], strides = [1, 1]} : vector<16x64xf32> to vector<16x16xf32>
    %11 = vector.extract_strided_slice %8 {offsets = [0, 32], sizes = [16, 16], strides = [1, 1]} : vector<16x64xf32> to vector<16x16xf32>
    %12 = vector.extract_strided_slice %8 {offsets = [0, 48], sizes = [16, 16], strides = [1, 1]} : vector<16x64xf32> to vector<16x16xf32>
    %13 = arith.truncf %9 : vector<16x16xf32> to vector<16x16xbf16>
    %14 = arith.truncf %10 : vector<16x16xf32> to vector<16x16xbf16>
    %cst_8 = arith.constant dense<0.000000e+00> : vector<16x16xf32>
    %15 = tpu.matmul %13, %14, %cst_8 {dimension_numbers = #tpu.dot_dimension_numbers<[1], [1], [0], [0], [0, 0, 1, 0], [], []>} : vector<16x16xbf16>, vector<16x16xbf16>, vector<16x16xf32> -> vector<16x16xf32>
    %cst_9 = arith.constant 2.500000e-01 : f32
    %16 = vector.broadcast %cst_9 : f32 to vector<16x16xf32>
    %17 = arith.mulf %15, %16 : vector<16x16xf32>
    %cst_10 = arith.constant -1.000000e+30 : f32
    %18 = vector.broadcast %cst_10 : f32 to vector<16x16xf32>
    %19 = arith.select %3, %17, %18 : vector<16x16xi1>, vector<16x16xf32>
    %cst_11 = arith.constant dense<0xFF800000> : vector<16xf32>
    %20 = vector.multi_reduction <maximumf>, %19, %cst_11 [1] : vector<16x16xf32> to vector<16xf32>
    %21 = vector.shape_cast %20 : vector<16xf32> to vector<16x1xf32>
    %22 = vector.broadcast %21 : vector<16x1xf32> to vector<16x16xf32>
    %23 = arith.subf %17, %22 : vector<16x16xf32>
    %24 = math.exp %23 : vector<16x16xf32>
    %cst_12 = arith.constant 0.000000e+00 : f32
    %25 = vector.broadcast %cst_12 : f32 to vector<16x16xf32>
    %26 = arith.select %3, %24, %25 : vector<16x16xi1>, vector<16x16xf32>
    %cst_13 = arith.constant dense<0.000000e+00> : vector<16xf32>
    %27 = vector.multi_reduction <add>, %26, %cst_13 [1] : vector<16x16xf32> to vector<16xf32>
    %28 = vector.shape_cast %27 : vector<16xf32> to vector<16x1xf32>
    %cst_14 = arith.constant 0.000000e+00 : f32
    %29 = vector.broadcast %cst_14 : f32 to vector<16x1xf32>
    %30 = arith.cmpf ogt, %28, %29 : vector<16x1xf32>
    %cst_15 = arith.constant 1.000000e+00 : f32
    %31 = vector.broadcast %cst_15 : f32 to vector<16x1xf32>
    %32 = arith.select %30, %28, %31 : vector<16x1xi1>, vector<16x1xf32>
    %33 = tpu.reciprocal %32 {approx = true} : vector<16x1xf32> -> vector<16x1xf32>
    %34 = vector.broadcast %33 : vector<16x1xf32> to vector<16x16xf32>
    %35 = arith.mulf %26, %34 : vector<16x16xf32>
    %36 = arith.truncf %35 : vector<16x16xf32> to vector<16x16xbf16>
    %37 = arith.truncf %11 : vector<16x16xf32> to vector<16x16xbf16>
    %cst_16 = arith.constant dense<0.000000e+00> : vector<16x16xf32>
    %38 = tpu.matmul %36, %37, %cst_16 {dimension_numbers = #tpu.dot_dimension_numbers<[1], [0], [0], [1], [0, 0, 1, 1], [], []>} : vector<16x16xbf16>, vector<16x16xbf16>, vector<16x16xf32> -> vector<16x16xf32>
    %39 = arith.addf %38, %12 : vector<16x16xf32>
    %cst_17 = arith.constant 0.000000e+00 : f32
    %40 = vector.broadcast %cst_17 : f32 to vector<16x16xf32>
    %41 = arith.maximumf %39, %40 : vector<16x16xf32>
    %42 = arith.truncf %41 : vector<16x16xf32> to vector<16x16xbf16>
    %c0_18 = arith.constant 0 : index
    %c0_19 = arith.constant 0 : index
    %43 = vector.load %arg5[%c0_18, %c0_19] : memref<16x64xbf16, #tpu.memory_space<vmem>>, vector<16x64xbf16>
    %cst_20 = arith.constant dense<0.000000e+00> : vector<16x64xf32>
    %44 = tpu.matmul %42, %43, %cst_20 {dimension_numbers = #tpu.dot_dimension_numbers<[1], [0], [0], [1], [0, 0, 1, 1], [], []>} : vector<16x16xbf16>, vector<16x64xbf16>, vector<16x64xf32> -> vector<16x64xf32>
    %c0_21 = arith.constant 0 : index
    %c0_22 = arith.constant 0 : index
    %45 = vector.load %arg6[%c0_21, %c0_22] : memref<1x64xf32, #tpu.memory_space<vmem>>, vector<1x64xf32>
    %46 = vector.broadcast %45 : vector<1x64xf32> to vector<16x64xf32>
    %47 = arith.addf %44, %46 : vector<16x64xf32>
    %48 = vector.extract_strided_slice %47 {offsets = [0, 0], sizes = [16, 16], strides = [1, 1]} : vector<16x64xf32> to vector<16x16xf32>
    %49 = vector.extract_strided_slice %47 {offsets = [0, 16], sizes = [16, 16], strides = [1, 1]} : vector<16x64xf32> to vector<16x16xf32>
    %50 = vector.extract_strided_slice %47 {offsets = [0, 32], sizes = [16, 16], strides = [1, 1]} : vector<16x64xf32> to vector<16x16xf32>
    %51 = vector.extract_strided_slice %47 {offsets = [0, 48], sizes = [16, 16], strides = [1, 1]} : vector<16x64xf32> to vector<16x16xf32>
    %52 = arith.truncf %48 : vector<16x16xf32> to vector<16x16xbf16>
    %53 = arith.truncf %49 : vector<16x16xf32> to vector<16x16xbf16>
    %cst_23 = arith.constant dense<0.000000e+00> : vector<16x16xf32>
    %54 = tpu.matmul %52, %53, %cst_23 {dimension_numbers = #tpu.dot_dimension_numbers<[1], [1], [0], [0], [0, 0, 1, 0], [], []>} : vector<16x16xbf16>, vector<16x16xbf16>, vector<16x16xf32> -> vector<16x16xf32>
    %cst_24 = arith.constant 2.500000e-01 : f32
    %55 = vector.broadcast %cst_24 : f32 to vector<16x16xf32>
    %56 = arith.mulf %54, %55 : vector<16x16xf32>
    %cst_25 = arith.constant -1.000000e+30 : f32
    %57 = vector.broadcast %cst_25 : f32 to vector<16x16xf32>
    %58 = arith.select %3, %56, %57 : vector<16x16xi1>, vector<16x16xf32>
    %cst_26 = arith.constant dense<0xFF800000> : vector<16xf32>
    %59 = vector.multi_reduction <maximumf>, %58, %cst_26 [1] : vector<16x16xf32> to vector<16xf32>
    %60 = vector.shape_cast %59 : vector<16xf32> to vector<16x1xf32>
    %61 = vector.broadcast %60 : vector<16x1xf32> to vector<16x16xf32>
    %62 = arith.subf %56, %61 : vector<16x16xf32>
    %63 = math.exp %62 : vector<16x16xf32>
    %cst_27 = arith.constant 0.000000e+00 : f32
    %64 = vector.broadcast %cst_27 : f32 to vector<16x16xf32>
    %65 = arith.select %3, %63, %64 : vector<16x16xi1>, vector<16x16xf32>
    %cst_28 = arith.constant dense<0.000000e+00> : vector<16xf32>
    %66 = vector.multi_reduction <add>, %65, %cst_28 [1] : vector<16x16xf32> to vector<16xf32>
    %67 = vector.shape_cast %66 : vector<16xf32> to vector<16x1xf32>
    %cst_29 = arith.constant 0.000000e+00 : f32
    %68 = vector.broadcast %cst_29 : f32 to vector<16x1xf32>
    %69 = arith.cmpf ogt, %67, %68 : vector<16x1xf32>
    %cst_30 = arith.constant 1.000000e+00 : f32
    %70 = vector.broadcast %cst_30 : f32 to vector<16x1xf32>
    %71 = arith.select %69, %67, %70 : vector<16x1xi1>, vector<16x1xf32>
    %72 = tpu.reciprocal %71 {approx = true} : vector<16x1xf32> -> vector<16x1xf32>
    %73 = vector.broadcast %72 : vector<16x1xf32> to vector<16x16xf32>
    %74 = arith.mulf %65, %73 : vector<16x16xf32>
    %75 = arith.truncf %74 : vector<16x16xf32> to vector<16x16xbf16>
    %76 = arith.truncf %50 : vector<16x16xf32> to vector<16x16xbf16>
    %cst_31 = arith.constant dense<0.000000e+00> : vector<16x16xf32>
    %77 = tpu.matmul %75, %76, %cst_31 {dimension_numbers = #tpu.dot_dimension_numbers<[1], [0], [0], [1], [0, 0, 1, 1], [], []>} : vector<16x16xbf16>, vector<16x16xbf16>, vector<16x16xf32> -> vector<16x16xf32>
    %78 = arith.addf %77, %51 : vector<16x16xf32>
    %cst_32 = arith.constant 0.000000e+00 : f32
    %79 = vector.broadcast %cst_32 : f32 to vector<16x16xf32>
    %80 = arith.maximumf %78, %79 : vector<16x16xf32>
    %81 = arith.truncf %80 : vector<16x16xf32> to vector<16x16xbf16>
    %cst_33 = arith.constant 1.000000e+00 : bf16
    %82 = vector.broadcast %cst_33 : bf16 to vector<1x16xbf16>
    %cst_34 = arith.constant dense<0.000000e+00> : vector<1x16xf32>
    %83 = tpu.matmul %82, %81, %cst_34 {dimension_numbers = #tpu.dot_dimension_numbers<[1], [0], [0], [1], [0, 0, 1, 1], [], []>} : vector<1x16xbf16>, vector<16x16xbf16>, vector<1x16xf32> -> vector<1x16xf32>
    %cst_35 = arith.constant 6.250000e-02 : f32
    %84 = vector.broadcast %cst_35 : f32 to vector<1x16xf32>
    %85 = arith.mulf %83, %84 : vector<1x16xf32>
    %86 = arith.truncf %85 : vector<1x16xf32> to vector<1x16xbf16>
    %c0_36 = arith.constant 0 : index
    %c0_37 = arith.constant 0 : index
    %87 = vector.load %arg7[%c0_36, %c0_37] : memref<16x64xbf16, #tpu.memory_space<vmem>>, vector<16x64xbf16>
    %cst_38 = arith.constant dense<0.000000e+00> : vector<1x64xf32>
    %88 = tpu.matmul %86, %87, %cst_38 {dimension_numbers = #tpu.dot_dimension_numbers<[1], [0], [0], [1], [0, 0, 1, 1], [], []>} : vector<1x16xbf16>, vector<16x64xbf16>, vector<1x64xf32> -> vector<1x64xf32>
    %c0_39 = arith.constant 0 : index
    %c0_40 = arith.constant 0 : index
    %89 = vector.load %arg8[%c0_39, %c0_40] : memref<1x64xf32, #tpu.memory_space<vmem>>, vector<1x64xf32>
    %90 = arith.addf %88, %89 : vector<1x64xf32>
    %cst_41 = arith.constant 0.000000e+00 : f32
    %91 = vector.broadcast %cst_41 : f32 to vector<1x64xf32>
    %92 = arith.cmpf ogt, %90, %91 : vector<1x64xf32>
    %93 = math.exp %90 : vector<1x64xf32>
    %cst_42 = arith.constant 1.000000e+00 : f32
    %94 = vector.broadcast %cst_42 : f32 to vector<1x64xf32>
    %95 = arith.subf %93, %94 : vector<1x64xf32>
    %96 = arith.select %92, %90, %95 : vector<1x64xi1>, vector<1x64xf32>
    %97 = arith.truncf %96 : vector<1x64xf32> to vector<1x64xbf16>
    %c0_43 = arith.constant 0 : index
    %c0_44 = arith.constant 0 : index
    %98 = vector.load %arg9[%c0_43, %c0_44] : memref<64x128xbf16, #tpu.memory_space<vmem>>, vector<64x128xbf16>
    %cst_45 = arith.constant dense<0.000000e+00> : vector<1x128xf32>
    %99 = tpu.matmul %97, %98, %cst_45 {dimension_numbers = #tpu.dot_dimension_numbers<[1], [0], [0], [1], [0, 0, 1, 1], [], []>} : vector<1x64xbf16>, vector<64x128xbf16>, vector<1x128xf32> -> vector<1x128xf32>
    %c0_46 = arith.constant 0 : index
    %c0_47 = arith.constant 0 : index
    %100 = vector.load %arg10[%c0_46, %c0_47] : memref<1x128xf32, #tpu.memory_space<vmem>>, vector<1x128xf32>
    %101 = arith.addf %99, %100 : vector<1x128xf32>
    %cst_48 = arith.constant 0.000000e+00 : f32
    %102 = vector.broadcast %cst_48 : f32 to vector<1x128xf32>
    %103 = arith.cmpf ogt, %101, %102 : vector<1x128xf32>
    %104 = math.exp %101 : vector<1x128xf32>
    %cst_49 = arith.constant 1.000000e+00 : f32
    %105 = vector.broadcast %cst_49 : f32 to vector<1x128xf32>
    %106 = arith.subf %104, %105 : vector<1x128xf32>
    %107 = arith.select %103, %101, %106 : vector<1x128xi1>, vector<1x128xf32>
    %108 = arith.truncf %107 : vector<1x128xf32> to vector<1x128xbf16>
    %c0_50 = arith.constant 0 : index
    %c0_51 = arith.constant 0 : index
    %109 = vector.load %arg11[%c0_50, %c0_51] : memref<128x3xbf16, #tpu.memory_space<vmem>>, vector<128x3xbf16>
    %cst_52 = arith.constant dense<0.000000e+00> : vector<1x3xf32>
    %110 = tpu.matmul %108, %109, %cst_52 {dimension_numbers = #tpu.dot_dimension_numbers<[1], [0], [0], [1], [0, 0, 1, 1], [], []>} : vector<1x128xbf16>, vector<128x3xbf16>, vector<1x3xf32> -> vector<1x3xf32>
    %c0_53 = arith.constant 0 : index
    %c0_54 = arith.constant 0 : index
    %111 = vector.load %arg12[%c0_53, %c0_54] : memref<1x3xf32, #tpu.memory_space<vmem>>, vector<1x3xf32>
    %112 = arith.addf %110, %111 : vector<1x3xf32>
    %cst_55 = arith.constant 0.000000e+00 : f32
    %113 = vector.broadcast %cst_55 : f32 to vector<1x3xf32>
    %114 = arith.cmpf ogt, %112, %113 : vector<1x3xf32>
    %115 = math.exp %112 : vector<1x3xf32>
    %cst_56 = arith.constant 1.000000e+00 : f32
    %116 = vector.broadcast %cst_56 : f32 to vector<1x3xf32>
    %117 = arith.subf %115, %116 : vector<1x3xf32>
    %118 = arith.select %114, %112, %117 : vector<1x3xi1>, vector<1x3xf32>
    %cst_57 = arith.constant dense<0xFF800000> : vector<1xf32>
    %119 = vector.multi_reduction <maximumf>, %118, %cst_57 [1] : vector<1x3xf32> to vector<1xf32>
    %120 = vector.shape_cast %119 : vector<1xf32> to vector<1x1xf32>
    %121 = vector.broadcast %120 : vector<1x1xf32> to vector<1x3xf32>
    %122 = arith.subf %118, %121 : vector<1x3xf32>
    %123 = math.exp %122 : vector<1x3xf32>
    %cst_58 = arith.constant dense<0.000000e+00> : vector<1xf32>
    %124 = vector.multi_reduction <add>, %123, %cst_58 [1] : vector<1x3xf32> to vector<1xf32>
    %125 = vector.shape_cast %124 : vector<1xf32> to vector<1x1xf32>
    %126 = vector.broadcast %125 : vector<1x1xf32> to vector<1x3xf32>
    %127 = arith.divf %123, %126 : vector<1x3xf32>
    %c0_59 = arith.constant 0 : index
    %c0_60 = arith.constant 0 : index
    %128 = vector.load %arg13[%c0_59, %c0_60] : memref<1x3xf32, #tpu.memory_space<vmem>>, vector<1x3xf32>
    tpu.vector_store %arg13[%c0_59, %c0_60], %127 {strides = array<i32>} : memref<1x3xf32, #tpu.memory_space<vmem>>, vector<1x3xf32>,
    return
  }
  func.func @transform_0(%arg0: i32) -> (i32, i32) {
    %c0_i32 = arith.constant 0 : i32
    %c0_i32_0 = arith.constant 0 : i32
    %c0_i32_1 = arith.constant 0 : i32
    return %c0_i32, %c0_i32_0 : i32, i32
  }
  func.func @transform_1(%arg0: i32) -> (i32, i32) {
    %c0_i32 = arith.constant 0 : i32
    %c0_i32_0 = arith.constant 0 : i32
    %c0_i32_1 = arith.constant 0 : i32
    return %c0_i32, %c0_i32_0 : i32, i32
  }
  func.func @transform_2(%arg0: i32) -> (i32, i32) {
    %c0_i32 = arith.constant 0 : i32
    %c0_i32_0 = arith.constant 0 : i32
    %c0_i32_1 = arith.constant 0 : i32
    return %c0_i32, %c0_i32_0 : i32, i32
  }
  func.func @transform_3(%arg0: i32) -> (i32, i32) {
    %c0_i32 = arith.constant 0 : i32
    %c0_i32_0 = arith.constant 0 : i32
    %c0_i32_1 = arith.constant 0 : i32
    return %c0_i32, %c0_i32_0 : i32, i32
  }
  func.func @transform_4(%arg0: i32) -> (i32, i32) {
    %c0_i32 = arith.constant 0 : i32
    %c0_i32_0 = arith.constant 0 : i32
    %c0_i32_1 = arith.constant 0 : i32
    return %c0_i32, %c0_i32_0 : i32, i32
  }
  func.func @transform_5(%arg0: i32) -> (i32, i32) {
    %c0_i32 = arith.constant 0 : i32
    %c0_i32_0 = arith.constant 0 : i32
    %c0_i32_1 = arith.constant 0 : i32
    return %c0_i32, %c0_i32_0 : i32, i32
  }
  func.func @transform_6(%arg0: i32) -> (i32, i32) {
    %c0_i32 = arith.constant 0 : i32
    %c0_i32_0 = arith.constant 0 : i32
    %c0_i32_1 = arith.constant 0 : i32
    return %c0_i32, %c0_i32_0 : i32, i32
  }
  func.func @transform_7(%arg0: i32) -> (i32, i32) {
    %c0_i32 = arith.constant 0 : i32
    %c0_i32_0 = arith.constant 0 : i32
    %c0_i32_1 = arith.constant 0 : i32
    return %c0_i32, %c0_i32_0 : i32, i32
  }
  func.func @transform_8(%arg0: i32) -> (i32, i32) {
    %c0_i32 = arith.constant 0 : i32
    %c0_i32_0 = arith.constant 0 : i32
    %c0_i32_1 = arith.constant 0 : i32
    return %c0_i32, %c0_i32_0 : i32, i32
  }
  func.func @transform_9(%arg0: i32) -> (i32, i32) {
    %c0_i32 = arith.constant 0 : i32
    %c0_i32_0 = arith.constant 0 : i32
    %c0_i32_1 = arith.constant 0 : i32
    return %c0_i32, %c0_i32_0 : i32, i32
  }
  func.func @transform_10(%arg0: i32) -> (i32, i32) {
    %c0_i32 = arith.constant 0 : i32
    %c0_i32_0 = arith.constant 0 : i32
    %c0_i32_1 = arith.constant 0 : i32
    return %c0_i32, %c0_i32_0 : i32, i32
  }
  func.func @transform_11(%arg0: i32) -> (i32, i32) {
    %c0_i32 = arith.constant 0 : i32
    %c0_i32_0 = arith.constant 0 : i32
    %c0_i32_1 = arith.constant 0 : i32
    return %c0_i32, %c0_i32_0 : i32, i32
  }
  func.func @transform_12(%arg0: i32) -> (i32, i32) {
    %c0_i32 = arith.constant 0 : i32
    %c0_i32_0 = arith.constant 0 : i32
    %c0_i32_1 = arith.constant 0 : i32
    return %c0_i32, %c0_i32_0 : i32, i32
  }
}

</mosaic_0001>

<bundles_post_ra>
// kernel: tpu_custom_call.1
= control target key start
LH: loop header
LB: loop body
LE: loop exit
PB: predicated region body
PF: predicated region fallthrough
CT: control target
= control target key end

     0   :  { %vm66_vm0 = vcmask 1041408   ;;  %vm62_vm1 = vcmask 31744   ;;  %s861_s0 = inlined_call_operand.vmem [shape: bf16[16,4], index: 0, kind: input, shape index: {}]   ;;  %s862_s1 = inlined_call_operand.vmem [shape: bf16[16,16], index: 1, kind: input, shape index: {}]   ;;  %s863_s2 = inlined_call_operand.vmem [shape: bf16[4,64], index: 2, kind: input, shape index: {}]   ;;  %s864_s3 = inlined_call_operand.vmem [shape: f32[1,64], index: 3, kind: input, shape index: {}]   ;;  %s865_s4 = inlined_call_operand.vmem [shape: bf16[16,64], index: 4, kind: input, shape index: {}]   ;;  %s866_s5 = inlined_call_operand.vmem [shape: f32[1,64], index: 5, kind: input, shape index: {}]   ;;  %s867_s6 = inlined_call_operand.vmem [shape: bf16[16,64], index: 6, kind: input, shape index: {}]   ;;  %s868_s7 = inlined_call_operand.vmem [shape: f32[1,64], index: 7, kind: input, shape index: {}]   ;;  %s869_s8 = inlined_call_operand.vmem [shape: bf16[64,128], index: 8, kind: input, shape index: {}]   ;;  %s870_s9 = inlined_call_operand.vmem [shape: f32[1,128], index: 9, kind: input, shape index: {}]   ;;  %s871_s10 = inlined_call_operand.vmem [shape: bf16[128,3], index: 10, kind: input, shape index: {}]   ;;  %s872_s11 = inlined_call_operand.vmem [shape: f32[1,3], index: 11, kind: input, shape index: {}]   ;;  %s873_s12 = inlined_call_operand.hbm [shape: f32[1,3], index: 12, kind: output, shape index: {}]  }
   0x1   :  { %v52_v0 = vld [vmem:[%s863_s2] sm:$0x3] }
   0x2   :  { %v68_v1 = vsel %vm66_vm0, %v52_v0, 0  ;;  %v592_v2 = vld [vmem:[%s861_s0] sm:$0xff] }
   0x3   :  { %77 = vmatpush.bf16.msra.mxu0 %v68_v1 }
   0x4   :  { %17 = vsyncpa [#allocation3], 0  ;;  %v616_v4 = vld [vmem:[%s864_s3] ss:$0 sm:$0xff]  ;;  %s670_s2 = smov 112   ;;  %vm88_vm2 = vcmask 130048  }
   0x5   :  { %v608_v11 = vld [vmem:[%s862_s1] sm:$0xff]   ;;  %s671_s1 = smov 80   ;;  %s672_s3 = smov 96   ;;  %vm372_vm10 = vcmask 523264   ;;  %vm478_vm12 = vcmask 16384  }
   0x6   :  { %524 = vmatmul.msk.bf16.vlgmr.msra.gmra.mxu0 %vm62_vm1, %v592_v2  ;;  %v609_v12 = vunpack.c.l.bf16 %v608_v11  ;;  %v610_v18 = vunpack.c.h.bf16 %v608_v11  ;;  %v593_v46 = vld [vmem:[%s865_s4] sm:$0xff]  ;;  %s511_s18 = sshll.u32 %s873_s12, 4  ;;  %s512_s18 = int_to_ptr.hbm [resolvable:$true] %s511_s18 }
   0x7   :  { %v617_v57 = vld [vmem:[%s866_s5] ss:$0 sm:$0xff] }
   0x8   :  { %vm755_vm3 = vcmp.gt.f32.partialorder %v609_v12, 0.0  ;;  %vm762_vm4 = vcmp.gt.f32.partialorder %v610_v18, 0.0 }
  0x83   :  { %v79_v3 = vpop.f32.mrf.mxu0 }
  0x84   :  { %v80_v6 = vadd.f32 %v616_v4, %v79_v3 }
  0x8b   :  { %v81_v5 = vpop.f32.mrf.mxu0 }
  0x8c   :  { %v82_v7 = vadd.f32 %v616_v4, %v81_v5 }
  0x8e   :  { %v84_v8 = vpack.c.bf16 %v82_v7, %v80_v6 }
  0x90   :  { %86 = vrot.lane.b32.xlu0 %v84_v8, %s670_s2 }
 0x102   :  { %v87_v9 = vpop.permute.xlu0 %86 }
 0x103   :  { %v93_v10 = vsel %vm88_vm2, %v87_v9, 0 }
 0x104   :  { %102 = vmatpush.bf16.xpose.msra.mxu1 %v93_v10 }
 0x10b   :  { %525 = vmatmul.msk.bf16.vlgmr.msra.gmra.mxu1 %vm88_vm2, %v84_v8 }
 0x188   :  { %v104_v13 = vpop.f32.mrf.mxu1 }
 0x189   :  { %v109_v15 = vmul.f32 0.25, %v104_v13 }
 0x18b   :  { %v111_v16 = vsel %vm755_vm3, %v109_v15, -1e+30 }
 0x18c   :  { %v113_v17 = vsel %vm88_vm2, %v111_v16, -inf }
 0x18d   :  { %114 = vmax.xlane.f32.xlu0 %v113_v17 }
 0x190   :  { %v106_v19 = vpop.f32.mrf.mxu1 }
 0x191   :  { %v110_v21 = vmul.f32 0.25, %v106_v19 }
 0x193   :  { %v112_v22 = vsel %vm762_vm4, %v110_v21, -1e+30 }
 0x194   :  { %v116_v23 = vsel %vm88_vm2, %v112_v22, -inf }
 0x195   :  { %117 = vmax.xlane.f32.xlu1 %v116_v23 }
 0x200   :  { %v115_v24 = vpop.xlane.xlu0 %114 }
 0x201   :  { %v119_v25 = vsub.f32 %v109_v15, %v115_v24 }
 0x203   :  { %v121_v26 = vmul.f32 1.442695, %v119_v25 }
 0x205   :  { %618 = vpow2.f32 %v121_v26 }
 0x208   :  { %v118_v27 = vpop.xlane.xlu1 %117 }
 0x209   :  { %v120_v28 = vsub.f32 %v110_v21, %v118_v27 }
 0x20b   :  { %v619_v29 = vpop.eup %618  ;;  %v123_v30 = vmul.f32 1.442695, %v120_v28 }
 0x20c   :  { %v125_v31 = vsel %vm755_vm3, %v619_v29, 0.0 }
 0x20d   :  { %620 = vpow2.f32 %v123_v30  ;;  %v127_v32 = vsel %vm88_vm2, %v125_v31, 0.0 }
 0x20e   :  { %128 = vadd.xlane.f32.xlu1 %v127_v32 }
 0x213   :  { %v621_v33 = vpop.eup %620 }
 0x214   :  { %v126_v34 = vsel %vm762_vm4, %v621_v33, 0.0 }
 0x215   :  { %v130_v35 = vsel %vm88_vm2, %v126_v34, 0.0 }
 0x216   :  { %131 = vadd.xlane.f32.xlu2 %v130_v35 }
 0x227   :  { %147 = vrot.lane.b32.xlu1 %v80_v6, %s671_s1 }
 0x22e   :  { %142 = vrot.lane.b32.xlu2 %v84_v8, %s672_s3 }
 0x236   :  { %149 = vrot.lane.b32.xlu2 %v82_v7, %s671_s1 }
 0x281   :  { %v129_v36 = vpop.xlane.xlu1 %128 }
 0x282   :  { %vm133_vm5 = vcmp.gt.f32.partialorder %v129_v36, 0.0 }
 0x283   :  { %v135_v37 = vsel %vm133_vm5, %v129_v36, 1.0 }
 0x284   :  { %622 = vrcp.f32 %v135_v37 }
 0x289   :  { %v132_v38 = vpop.xlane.xlu2 %131 }
 0x28a   :  { %vm134_vm6 = vcmp.gt.f32.partialorder %v132_v38, 0.0  ;;  %v623_v40 = vpop.eup %622 }
 0x28b   :  { %v136_v39 = vsel %vm134_vm6, %v132_v38, 1.0  ;;  %v139_v43 = vmul.f32 %v623_v40, %v125_v31  ;;  %v594_v40 = vld [vmem:[%s867_s6] sm:$0xff] }
 0x28c   :  { %624 = vrcp.f32 %v136_v39  ;;  %v673_v39 = vmov 1065369472   ;;  %327 = vmatpush.bf16.msrb.mxu1 %v594_v40 }
 0x291   :  { %v143_v41 = vpop.permute.xlu2 %142 }
 0x292   :  { %v625_v42 = vpop.eup %624  ;;  %163 = vmatpush.bf16.msra.mxu3 %v143_v41 }
 0x293   :  { %v140_v44 = vmul.f32 %v625_v42, %v126_v34 }
 0x295   :  { %v141_v45 = vpack.c.bf16 %v140_v44, %v139_v43 }
 0x296   :  { %195 = vmatpush.bf16.msrb.mxu3 %v593_v46  ;;  %v597_v46 = vld [vmem:[%s869_s8 + $0x10] sm:$0xff] }
 0x297   :  { %526 = vmatmul.msk.bf16.vlgmr.msra.gmra.mxu3 %vm88_vm2, %v141_v45  ;;  %v598_v45 = vld [vmem:[%s869_s8 + $0x18] sm:$0xff] }
 0x299   :  { %v148_v48 = vpop.permute.xlu1 %147  ;;  %v150_v50 = vpop.permute.xlu2 %149 }
 0x31a   :  { %v165_v47 = vpop.f32.mrf.mxu3 }
 0x31b   :  { %v166_v49 = vadd.f32 %v165_v47, %v148_v48  ;;  %v596_v47 = vld [vmem:[%s869_s8 + $0x8] sm:$0xff]  ;;  %v595_v48 = vld [vmem:[%s869_s8] sm:$0xff] }
 0x31d   :  { %v170_v53 = vmax.f32 %v166_v49, 0.0  ;;  %v606_v49 = vld [vmem:[%s871_s10 + $0x38] sm:$0xff] }
 0x322   :  { %v167_v51 = vpop.f32.mrf.mxu3 }
 0x323   :  { %v168_v52 = vadd.f32 %v167_v51, %v150_v50  ;;  %v605_v50 = vld [vmem:[%s871_s10 + $0x30] sm:$0xff]  ;;  %v604_v51 = vld [vmem:[%s871_s10 + $0x28] sm:$0xff] }
 0x325   :  { %v171_v54 = vmax.f32 %v168_v52, 0.0  ;;  %v603_v52 = vld [vmem:[%s871_s10 + $0x20] sm:$0xff] }
 0x327   :  { %v172_v55 = vpack.c.bf16 %v171_v54, %v170_v53  ;;  %v310_v53 = vld [vmem:[%s868_s7] sm:$0x1] }
 0x329   :  { %531 = vmatmul.msk.bf16.vlgmr.msrb.gmra.mxu3 %vm88_vm2, %v172_v55 }
 0x3ac   :  { %v197_v56 = vpop.f32.mrf.mxu3 }
 0x3ad   :  { %v198_v59 = vadd.f32 %v617_v57, %v197_v56 }
 0x3b4   :  { %v199_v58 = vpop.f32.mrf.mxu3 }
 0x3b5   :  { %v200_v60 = vadd.f32 %v617_v57, %v199_v58 }
 0x3b7   :  { %v202_v61 = vpack.c.bf16 %v200_v60, %v198_v59 }
 0x3b9   :  { %204 = vrot.lane.b32.xlu2 %v202_v61, %s670_s2 }
 0x413   :  { %v205_v62 = vpop.permute.xlu2 %204 }
 0x414   :  { %v210_v63 = vsel %vm88_vm2, %v205_v62, 0  ;;  %v602_v62 = vld [vmem:[%s871_s10 + $0x18] sm:$0xff] }
 0x415   :  { %219 = vmatpush.bf16.xpose.msrb.mxu0 %v210_v63  ;;  %v601_v63 = vld [vmem:[%s871_s10 + $0x10] sm:$0xff] }
 0x41c   :  { %532 = vmatmul.msk.bf16.vlgmr.msrb.gmra.mxu0 %vm88_vm2, %v202_v61 }
 0x41d   :  { %380 = vmatpush.bf16.msra.mxu0 %v598_v45 }
 0x421   :  { %381 = vmatpush.bf16.msra.mxu0 %v597_v46 }
 0x425   :  { %382 = vmatpush.bf16.msra.mxu0 %v596_v47 }
 0x429   :  { %383 = vmatpush.bf16.msra.mxu0 %v595_v48 }
 0x499   :  { %v221_v0 = vpop.f32.mrf.mxu0 }
 0x49a   :  { %v226_v1 = vmul.f32 0.25, %v221_v0  ;;  %v600_v0 = vld [vmem:[%s871_s10 + $0x8] sm:$0xff] }
 0x49c   :  { %v228_v2 = vsel %vm755_vm3, %v226_v1, -1e+30 }
 0x49d   :  { %v230_v3 = vsel %vm88_vm2, %v228_v2, -inf  ;;  %v347_v2 = vld [vmem:[%s870_s9] sm:$0x1]  ;;  %s674_s9 = smov [#allocation2]  }
 0x49e   :  { %231 = vmax.xlane.f32.xlu1 %v230_v3 }
 0x4a1   :  { %v223_v4 = vpop.f32.mrf.mxu0 }
 0x4a2   :  { %v227_v5 = vmul.f32 0.25, %v223_v4 }
 0x4a4   :  { %v229_v6 = vsel %vm762_vm4, %v227_v5, -1e+30 }
 0x4a5   :  { %v233_v7 = vsel %vm88_vm2, %v229_v6, -inf }
 0x4a6   :  { %234 = vmax.xlane.f32.xlu2 %v233_v7 }
 0x4b7   :  { %264 = vrot.lane.b32.xlu1 %v198_v59, %s671_s1 }
 0x511   :  { %v232_v8 = vpop.xlane.xlu1 %231 }
 0x512   :  { %v236_v9 = vsub.f32 %v226_v1, %v232_v8  ;;  %v599_v1 = vld [vmem:[%s871_s10] sm:$0xff]  ;;  %s509_s10 = sshll.u32 %s674_s9, 4  ;;  %s510_s10 = int_to_ptr.vmem [resolvable:$true] %s509_s10 }
 0x514   :  { %v238_v10 = vmul.f32 1.442695, %v236_v9 }
 0x516   :  { %626 = vpow2.f32 %v238_v10 }
 0x519   :  { %v235_v11 = vpop.xlane.xlu2 %234 }
 0x51a   :  { %v237_v12 = vsub.f32 %v227_v5, %v235_v11  ;;  %v411_v11 = vld [vmem:[%s872_s11] sm:$0x1] }
 0x51c   :  { %v627_v13 = vpop.eup %626  ;;  %v240_v15 = vmul.f32 1.442695, %v237_v12 }
 0x51d   :  { %v242_v16 = vsel %vm755_vm3, %v627_v13, 0.0 }
 0x51e   :  { %628 = vpow2.f32 %v240_v15  ;;  %v244_v17 = vsel %vm88_vm2, %v242_v16, 0.0 }
 0x51f   :  { %245 = vadd.xlane.f32.xlu0 %v244_v17 }
 0x524   :  { %v629_v18 = vpop.eup %628 }
 0x525   :  { %v243_v19 = vsel %vm762_vm4, %v629_v18, 0.0 }
 0x526   :  { %v247_v21 = vsel %vm88_vm2, %v243_v19, 0.0 }
 0x527   :  { %248 = vadd.xlane.f32.xlu0 %v247_v21 }
 0x529   :  { %v265_v31 = vpop.permute.xlu1 %264 }
 0x53b   :  { %259 = vrot.lane.b32.xlu0 %v202_v61, %s672_s3 }
 0x543   :  { %266 = vrot.lane.b32.xlu0 %v200_v60, %s671_s1 }
 0x592   :  { %v246_v22 = vpop.xlane.xlu0 %245 }
 0x593   :  { %vm250_vm8 = vcmp.gt.f32.partialorder %v246_v22, 0.0 }
 0x594   :  { %v252_v24 = vsel %vm250_vm8, %v246_v22, 1.0 }
 0x59a   :  { %v249_v23 = vpop.xlane.xlu0 %248 }
 0x59b   :  { %vm251_vm7 = vcmp.gt.f32.partialorder %v249_v23, 0.0 }
 0x59c   :  { %v253_v14 = vsel %vm251_vm7, %v249_v23, 1.0 }
 0x59d   :  { %630 = vrcp.f32 %v253_v14 }
 0x59e   :  { %632 = vrcp.f32 %v252_v24 }
 0x5a3   :  { %v631_v25 = vpop.eup %630 }
 0x5a4   :  { %v633_v26 = vpop.eup %632  ;;  %v257_v27 = vmul.f32 %v631_v25, %v243_v19 }
 0x5a5   :  { %v256_v28 = vmul.f32 %v633_v26, %v242_v16 }
 0x5a7   :  { %v258_v29 = vpack.c.bf16 %v257_v27, %v256_v28 }
 0x5ad   :  { %v260_v20 = vpop.permute.xlu0 %259 }
 0x5ae   :  { %280 = vmatpush.bf16.msra.mxu2 %v260_v20 }
 0x5b1   :  { %533 = vmatmul.msk.bf16.vlgmr.msra.gmra.mxu2 %vm88_vm2, %v258_v29 }
 0x5b2   :  { %460 = vmatpush.bf16.msrb.mxu2 %v606_v49 }
 0x5b5   :  { %v267_v33 = vpop.permute.xlu0 %266 }
 0x5b6   :  { %461 = vmatpush.bf16.msrb.mxu2 %v605_v50 }
 0x5ba   :  { %462 = vmatpush.bf16.msrb.mxu2 %v604_v51 }
 0x5be   :  { %463 = vmatpush.bf16.msrb.mxu2 %v603_v52 }
 0x5c2   :  { %464 = vmatpush.bf16.msrb.mxu2 %v602_v62 }
 0x5c6   :  { %465 = vmatpush.bf16.msrb.mxu2 %v601_v63 }
 0x5ca   :  { %466 = vmatpush.bf16.msrb.mxu2 %v600_v0 }
 0x5ce   :  { %467 = vmatpush.bf16.msrb.mxu2 %v599_v1 }
 0x634   :  { %v282_v30 = vpop.f32.mrf.mxu2 }
 0x635   :  { %v283_v32 = vadd.f32 %v282_v30, %v265_v31 }
 0x637   :  { %v287_v36 = vmax.f32 %v283_v32, 0.0 }
 0x63c   :  { %v284_v34 = vpop.f32.mrf.mxu2 }
 0x63d   :  { %v285_v35 = vadd.f32 %v284_v34, %v267_v33 }
 0x63f   :  { %v288_v37 = vmax.f32 %v285_v35, 0.0 }
 0x641   :  { %v289_v38 = vpack.c.bf16 %v288_v37, %v287_v36 }
 0x643   :  { %300 = vmatpush.bf16.msra.mxu3 %v289_v38 }
 0x646   :  { %534 = vmatmul.msk.bf16.vlgmr.msra.gmra.mxu3 %vm88_vm2, %v673_v39 }
 0x6c9   :  { %v302_v41 = vpop.f32.mrf.mxu3 }
 0x6ca   :  { %v306_v42 = vmul.f32 0.0625, %v302_v41 }
 0x6cc   :  { %v307_v43 = vpack.c.bf16 %v306_v42, %v306_v42 }
 0x6ce   :  { %539 = vmatmul.msk.bf16.vlgmr.msrb.gmra.mxu1 %vm88_vm2, %v307_v43 }
 0x6d1   :  { %v304_v44 = vpop.f32.mrf.mxu3 }
 0x74b   :  { %v329_v54 = vpop.f32.mrf.mxu1 }
 0x74c   :  { %v330_v55 = vadd.f32 %v329_v54, %v310_v53 }
 0x74e   :  { %v334_v56 = vmul.f32 1.442695, %v330_v55  ;;  %vm333_vm9 = vcmp.gt.f32.partialorder %v330_v55, 0.0 }
 0x750   :  { %634 = vpow2.f32 %v334_v56 }
 0x753   :  { %v331_v57 = vpop.f32.mrf.mxu1 }
 0x756   :  { %v635_v58 = vpop.eup %634 }
 0x757   :  { %v540_v59 = vadd.f32 -1.0, %v635_v58 }
 0x759   :  { %v337_v60 = vsel %vm333_vm9, %v330_v55, %v540_v59 }
 0x75a   :  { %v338_v61 = vpack.c.bf16 %v337_v60, %v337_v60 }
 0x75c   :  { %557 = vmatmul.msk.bf16.vlgmr.msra.gmra.mxu0 %vm372_vm10, %v338_v61 }
 0x7d9   :  { %v385_v3 = vpop.f32.mrf.mxu0 }
 0x7da   :  { %v386_v4 = vadd.f32 %v385_v3, %v347_v2 }
 0x7dc   :  { %v390_v5 = vmul.f32 1.442695, %v386_v4  ;;  %vm389_vm11 = vcmp.gt.f32.partialorder %v386_v4, 0.0 }
 0x7de   :  { %636 = vpow2.f32 %v390_v5 }
 0x7e1   :  { %v387_v6 = vpop.f32.mrf.mxu0 }
 0x7e4   :  { %v637_v7 = vpop.eup %636 }
 0x7e5   :  { %v558_v8 = vadd.f32 -1.0, %v637_v7 }
 0x7e7   :  { %v393_v9 = vsel %vm389_vm11, %v386_v4, %v558_v8 }
 0x7e8   :  { %v394_v10 = vpack.c.bf16 %v393_v9, %v393_v9 }
 0x7ea   :  { %468 = vmatmul.bf16.vlgmr.msrb.gmra.mxu2 %v394_v10 }
 0x86d   :  { %v469_v12 = vpop.f32.mrf.mxu2 }
 0x86e   :  { %v470_v13 = vadd.f32 %v469_v12, %v411_v11 }
 0x870   :  { %v474_v15 = vmul.f32 1.442695, %v470_v13  ;;  %vm473_vm13 = vcmp.gt.f32.partialorder %v470_v13, 0.0 }
 0x872   :  { %638 = vpow2.f32 %v474_v15 }
 0x875   :  { %v471_v16 = vpop.f32.mrf.mxu2 }
 0x878   :  { %v639_v17 = vpop.eup %638 }
 0x879   :  { %v591_v18 = vadd.f32 -1.0, %v639_v17 }
 0x87b   :  { %v477_v19 = vsel %vm473_vm13, %v470_v13, %v591_v18 }
 0x87c   :  { %v479_v21 = vsel %vm478_vm12, %v477_v19, -inf }
 0x87d   :  { %480 = vmax.xlane.f32.xlu2 %v479_v21 }
 0x8f0   :  { %v481_v22 = vpop.xlane.xlu2 %480 }
 0x8f1   :  { %v482_v23 = vsub.f32 %v477_v19, %v481_v22 }
 0x8f3   :  { %v483_v14 = vmul.f32 1.442695, %v482_v23 }
 0x8f5   :  { %640 = vpow2.f32 %v483_v14 }
 0x8fb   :  { %v641_v24 = vpop.eup %640 }
 0x8fc   :  { %v485_v25 = vsel %vm478_vm12, %v641_v24, 0.0 }
 0x8fd   :  { %486 = vadd.xlane.f32.xlu0 %v485_v25 }
 0x970   :  { %v487_v26 = vpop.xlane.xlu0 %486 }
 0x971   :  { %642 = vrcp.f32 %v487_v26  ;;  %v499_v29 = vand.u32 2147483648, %v487_v26  ;;  %v497_v31 = vand.u32 2147483647, %v487_v26  ;;  %vm493_vm15 = vweird.f32 %v487_v26 }
 0x973   :  { %v500_v33 = vor.u32 1.1754944e-38, %v499_v29  ;;  %vm498_vm1 = vcmp.eq.f32.partialorder %v497_v31, 8.507059e+37 }
 0x977   :  { %v643_v27 = vpop.eup %642 }
 0x978   :  { %v489_v20 = vmul.f32 %v643_v27, %v487_v26  ;;  %vm494_vm14 = vweird.f32 %v643_v27 }
 0x979   :  { %vm495_vm0 = vmor %vm493_vm15, %vm494_vm14 }
 0x97a   :  { %v490_v28 = vsub.f32 1.0, %v489_v20 }
 0x97c   :  { %v491_v30 = vmul.f32 %v643_v27, %v490_v28 }
 0x97e   :  { %v492_v32 = vadd.f32 %v643_v27, %v491_v30 }
 0x980   :  { %v496_v34 = vsel %vm495_vm0, %v643_v27, %v492_v32 }
 0x981   :  { %v501_v35 = vsel %vm498_vm1, %v500_v33, %v496_v34 }
 0x982   :  { %v502_v36 = vmul.f32 %v641_v24, %v501_v35 }
 0x984   :  { %503 = vst.msk [vmem:[#allocation2] sm:$0x1] %vm478_vm12, %v502_v36 }
 0x985   :  { %514 = dma.vmem_to_hbm [thread:$0]  %s510_s10, 16, %s512_s18, [#allocation3]  }
 0x986   :  { %668 = dma.done.wait [#allocation3], 16  }
 0x987   :  { %669 = vsyncadd [#allocation3], 4294967280 }
 0x988   :  { %519 = vsyncpa [#allocation3], 1 }

</bundles_post_ra>
